<compile_context>
chip_gen: v6e
topology: v6e:2x2x1
jax: 0.10.0
libtpu: 0.0.40
codegen_flags: <defaults>
</compile_context>

<pallas_src>
import functools
import sys

import numpy as np
import jax
import jax.numpy as jnp
from jax import lax
from jax.experimental import pallas as pl
from jax.experimental.pallas import tpu as pltpu


# ------------------- one-time SMEM-output capability check -------------------
_SMEM_OUTPUT_OK = None


def _smem_output_supported():
    """Cached, one-time probe: can pallas_call outputs live in SMEM?"""
    global _SMEM_OUTPUT_OK
    if _SMEM_OUTPUT_OK is None:
        def probe(o_ref):
            o_ref[0, pl.program_id(0)] = jnp.int32(7)   # dynamic scalar store

        try:
            out = pl.pallas_call(
                probe,
                out_shape=jax.ShapeDtypeStruct((1, 8), jnp.int32),
                grid=(1,),
                out_specs=pl.BlockSpec((1, 8), lambda i: (0, 0),
                                       memory_space=pltpu.MemorySpace.SMEM),
            )()
            jax.block_until_ready(out)
            _SMEM_OUTPUT_OK = True
        except Exception as e:  # noqa: BLE001 - capability probe, decided once
            print("fps_pallas: SMEM outputs unavailable (%s); using VMEM "
                  "one-hot index writeback." % type(e).__name__,
                  file=sys.stderr)
            _SMEM_OUTPUT_OK = False
    return _SMEM_OUTPUT_OK


# ----------------------------- Pallas kernel --------------------------------
def _fps_kernel(start_ref, norm_ref, mask_ref, idx_ref, *, m, nb, rows, cols,
                idx_in_smem):
    """Farthest point sampling for `nb` batch elements per grid step.

    start_ref : SMEM (bs,) int32           initial farthest index (scalar prefetch)
    norm_ref  : VMEM (nb, n, rows, cols)   squared pairwise norms, lane-dense packed
    mask_ref  : VMEM (nb, rows, cols)      valid-point mask as float (1.0 / 0.0)
    idx_ref   : SMEM/VMEM (nb, m) int32    chosen indices for these batch elements
    """
    b0 = pl.program_id(0) * nb
    total = rows * cols

    sub_io = lax.broadcasted_iota(jnp.int32, (1, rows, cols), 1)
    lane_io = lax.broadcasted_iota(jnp.int32, (1, rows, cols), 2)
    iota_flat = sub_io * cols + lane_io               # flat point index per slot

    # Mask folded into the init: masked-off (and pad) slots start at -100 and
    # stay there (min with squared distances >= 0), exactly matching the
    # reference's per-iteration where(mask, dist, -100).  Valid slots start at
    # the squared-distance sentinel 1e30.
    far0 = tuple(start_ref[b0 + j] for j in range(nb))
    dist0 = tuple(
        jnp.where(mask_ref[pl.ds(j, 1), :, :] > 0.5,
                  jnp.float32(1e30), jnp.float32(-100.0))
        for j in range(nb))

    if idx_in_smem:
        chosen0 = tuple(jnp.int32(0) for _ in range(nb))   # dummy carry

        def record(j, i, far, ch):
            idx_ref[j, i] = far                            # scalar SMEM store
            return ch
    else:
        # Fallback: build `chosen` with per-iteration one-hot selects.
        iota_m = lax.broadcasted_iota(jnp.int32, (1, m), 1)
        chosen0 = tuple(jnp.zeros((1, m), jnp.int32) for _ in range(nb))

        def record(j, i, far, ch):
            return jnp.where(iota_m == i, far, ch)

    def body(i, carry):
        fars, dists, chosens = carry
        new_f, new_d, new_c = [], [], []
        # nb independent serial chains, Python-unrolled so the VLIW scheduler
        # can interleave their XLU reductions and vector->scalar extracts.
        for j in range(nb):
            far, dist, ch = fars[j], dists[j], chosens[j]
            # chosen_indices[:, i] = farthest
            ch = record(j, i, far, ch)
            # Squared distance from point `far` to all points: a single row
            # load (the reduction over d happened in the pre-pass).
            row = norm_ref[j, pl.ds(far, 1), :, :]         # (1, rows, cols)
            dist = jnp.minimum(dist, row)
            # farthest = argmax(dist), first index on ties.
            maxv = jnp.max(dist)
            far = jnp.min(
                jnp.where(dist == maxv, iota_flat, total)).astype(jnp.int32)
            new_f.append(far)
            new_d.append(dist)
            new_c.append(ch)
        return tuple(new_f), tuple(new_d), tuple(new_c)

    _, _, chosens = lax.fori_loop(0, m, body, (far0, dist0, chosen0))
    if not idx_in_smem:
        for j in range(nb):
            idx_ref[pl.ds(j, 1), :] = chosens[j]


def _fps_pallas_call(norms_packed, mask_packed, start, *, n, m, rows, cols, nb,
                     idx_in_smem):
    bs = mask_packed.shape[0]
    kernel = functools.partial(_fps_kernel, m=m, nb=nb, rows=rows, cols=cols,
                               idx_in_smem=idx_in_smem)
    idx_space = pltpu.MemorySpace.SMEM if idx_in_smem else None

    # VMEM budget: the double-buffered (nb, n, rows, cols) f32 norm block
    # dominates; mask / idx blocks and compiler scratch get a few MiB of slack.
    block_bytes = nb * n * rows * cols * 4
    try:
        vmem_cap = int(pltpu.get_tpu_info().vmem_capacity_bytes)
    except Exception:  # noqa: BLE001 - host-side query; conservative default
        vmem_cap = 64 * 2**20                      # v7x-sized floor
    vmem_limit = int(max(8 * 2**20,
                         min(vmem_cap - 4 * 2**20,
                             2 * block_bytes + 4 * 2**20)))

    return pl.pallas_call(
        kernel,
        out_shape=jax.ShapeDtypeStruct((bs, m), jnp.int32),
        grid_spec=pltpu.PrefetchScalarGridSpec(
            num_scalar_prefetch=1,
            grid=(bs // nb,),
            in_specs=[
                pl.BlockSpec((nb, n, rows, cols), lambda b, s: (b, 0, 0, 0)),
                pl.BlockSpec((nb, rows, cols), lambda b, s: (b, 0, 0)),
            ],
            out_specs=pl.BlockSpec((nb, m), lambda b, s: (b, 0),
                                   memory_space=idx_space),
        ),
        compiler_params=pltpu.CompilerParams(
            dimension_semantics=("parallel",),
            vmem_limit_bytes=vmem_limit),
    )(start, norms_packed, mask_packed)


def fps_indices_pallas(abq_pairs, mask, start, m):
    """chosen_indices (bs, m) int32 via the Pallas FPS kernel."""
    bs, n, _, d = abq_pairs.shape

    # Pre-pass: reduce over d once (streaming; the upcast from bf16/f16 inputs
    # fuses into it).  FPS only compares distances and sqrt is monotone, so
    # squared norms give identical indices while using d x less VMEM / HBM.
    norms = jnp.sum(jnp.square(abq_pairs.astype(jnp.float32)), axis=-1)  # (bs,n,n)

    # Lane-dense packing of the point axis: full 128-lane rows when possible,
    # else zero-padded (8, ceil(n/8)).  Pad columns are masked off (-100) and
    # can never be selected.
    if n % 128 == 0:
        n_pad, rows, cols = n, n // 128, 128
    else:
        n_pad = ((n + 7) // 8) * 8
        rows, cols = 8, n_pad // 8
    if n_pad != n:
        pad = n_pad - n
        norms = jnp.pad(norms, ((0, 0), (0, 0), (0, pad)))
        maskf = jnp.pad(mask.astype(jnp.float32), ((0, 0), (0, pad)))
    else:
        maskf = mask.astype(jnp.float32)
    norms_packed = norms.reshape(bs, n, rows, cols)
    mask_packed = maskf.reshape(bs, rows, cols)
    start = start.astype(jnp.int32)

    # Two independent FPS chains per grid step (when bs is even) to hide the
    # serial XLU-reduce / scalar-extract latency; fall back to one chain if
    # doubling the block would blow a conservative (v7x-sized) VMEM budget.
    nb = 2 if bs % 2 == 0 else 1
    if nb == 2 and 2 * 2 * n * n_pad * 4 > 48 * 2**20:
        nb = 1

    return _fps_pallas_call(norms_packed, mask_packed, start,
                            n=n, m=m, rows=rows, cols=cols, nb=nb,
                            idx_in_smem=_smem_output_supported())


# ------------------------------- Module -------------------------------------
class FPSsubsample:
    """JAX/Pallas port of lie_conv.lieConv.FPSsubsample (group=None path)."""

    def __init__(self, ds_frac, cache=False, group=None):
        self.ds_frac = ds_frac
        self.cache = cache
        self.cached_indices = None
        self.group = group  # group distance not used here (norm over last dim)

    def _start_indices(self, mask, key):
        # Deterministic replacement for torch.randint initial farthest points:
        # a ~ randint(0, n); pick the (a % num_valid)-th valid index per batch.
        bs, n = mask.shape
        a = jax.random.randint(key, (bs,), 0, n)
        counts = jnp.maximum(jnp.sum(mask.astype(jnp.int32), axis=-1), 1)
        r = a % counts
        cums = jnp.cumsum(mask.astype(jnp.int32), axis=-1)
        start = jnp.argmax((cums == (r + 1)[:, None]).astype(jnp.int32),
                           axis=-1).astype(jnp.int32)
        return start

    def __call__(self, inp, key, withquery=False):
        abq_pairs, vals, mask = inp
        if self.ds_frac != 1:
            bs, n = mask.shape
            m = int(np.round(self.ds_frac * n))
            if self.cache and self.cached_indices is not None:
                query_idx = self.cached_indices
            else:
                start = self._start_indices(mask, key)
                query_idx = fps_indices_pallas(abq_pairs, mask, start, m)
                if self.cache:
                    self.cached_indices = query_idx
            B = jnp.arange(bs)[:, None]
            # Single fused 2-axis gather, bit-identical to the PyTorch
            # abq_pairs[B, query_idx][B, :, query_idx] double gather but
            # without materializing the (bs, m, n, d) intermediate.
            B3 = jnp.arange(bs)[:, None, None]
            subsampled_abq_pairs = abq_pairs[
                B3, query_idx[:, None, :], query_idx[:, :, None]]
            subsampled_values = vals[B, query_idx]
            subsampled_mask = mask[B, query_idx]
        else:
            subsampled_abq_pairs = abq_pairs
            subsampled_values = vals
            subsampled_mask = mask
            query_idx = None
        if withquery:
            return (subsampled_abq_pairs, subsampled_values,
                    subsampled_mask, query_idx)
        return (subsampled_abq_pairs, subsampled_values, subsampled_mask)


# --------------------------- NumPy reference ---------------------------------
def _fps_indices_ref(abq, mask, start, m):
    """Torch-faithful reference (sqrt distances, 1e8 sentinel); sqrt is monotone
    so the chosen indices match the squared-distance kernel exactly."""
    abq = np.asarray(abq, np.float32)
    mask = np.asarray(mask)
    start = np.asarray(start)
    bs, n = mask.shape
    dists = np.sqrt(np.sum(abq * abq, axis=-1))              # (bs, n, n)
    chosen = np.zeros((bs, m), np.int32)
    distances = np.full((bs, n), 1e8, np.float32)
    farthest = start.astype(np.int32).copy()
    for i in range(m):
        chosen[:, i] = farthest
        for b in range(bs):
            row = np.where(mask[b], dists[b, farthest[b]],
                           np.float32(-100.0)).astype(np.float32)
            closer = row < distances[b]
            distances[b, closer] = row[closer]
            farthest[b] = int(np.argmax(distances[b]))
    return chosen


# --------------------------------- Main --------------------------------------
if __name__ == "__main__":
    key = jax.random.PRNGKey(0)
    k1, k2, k3 = jax.random.split(key, 3)

    bs, n, d, c = 2, 16, 4, 6
    ds_frac = 0.5                      # -> m = 8

    abq_pairs = jax.random.normal(k1, (bs, n, n, d), dtype=jnp.float32)
    vals = jax.random.normal(k2, (bs, n, c), dtype=jnp.float32)
    lengths = jnp.array([16, 12], dtype=jnp.int32)
    mask = (jnp.arange(n)[None, :] < lengths[:, None])      # (bs, n) bool

    module = FPSsubsample(ds_frac, cache=False, group=None)
    sub_abq, sub_vals, sub_mask, query_idx = module(
        (abq_pairs, vals, mask), k3, withquery=True)

    sub_abq = jax.block_until_ready(sub_abq)
    sub_vals = jax.block_until_ready(sub_vals)
    sub_mask = jax.block_until_ready(sub_mask)
    query_idx = jax.block_until_ready(query_idx)

    # Cross-check the Pallas FPS against the torch-faithful NumPy reference.
    m = int(np.round(ds_frac * n))
    start = module._start_indices(mask, k3)
    ref_idx = _fps_indices_ref(abq_pairs, mask, start, m)
    assert np.array_equal(np.asarray(query_idx), ref_idx), (
        np.asarray(query_idx), ref_idx)

    # Sanity on shapes / gathers (fused gather == PyTorch double gather).
    assert sub_abq.shape == (bs, m, m, d)
    assert sub_vals.shape == (bs, m, c)
    assert sub_mask.shape == (bs, m)
    B = np.arange(bs)[:, None]
    abq_np = np.asarray(abq_pairs)
    ref_double = abq_np[B, ref_idx][B, :, ref_idx]
    assert np.array_equal(np.asarray(sub_abq), ref_double)
    assert np.allclose(np.asarray(sub_vals), np.asarray(vals)[B, ref_idx])
    assert np.array_equal(np.asarray(sub_mask), np.asarray(mask)[B, ref_idx])

    print("KERNEL_OK")
</pallas_src>

<mosaic_0001>
module attributes {stable_mosaic.version = 11 : i64} {
  func.func @_fps_kernel(%arg0: i32, %arg1: memref<2xi32, #tpu.memory_space<smem>>, %arg2: memref<2x16x8x2xf32, #tpu.memory_space<vmem>>, %arg3: memref<2x8x2xf32, #tpu.memory_space<vmem>>, %arg4: memref<2x8xi32, #tpu.memory_space<vmem>>) attributes {dimension_semantics = [#tpu.dimension_semantics<parallel>], iteration_bounds = array<i64: 1>, scalar_prefetch = 1 : i64, scratch_operands = 0 : i64, tpu.core_type = #tpu.core_type<tc>, window_params = [{transform_indices = @transform_0, window_bounds = array<i64: 2, 16, 8, 2>}, {transform_indices = @transform_1, window_bounds = array<i64: 2, 8, 2>}, {transform_indices = @transform_2, window_bounds = array<i64: 2, 8>}]} {
    %c2_i32 = arith.constant 2 : i32
    %0 = arith.muli %arg0, %c2_i32 : i32
    %1 = tpu.iota {dimensions = array<i32: 1>} : vector<1x8x2xi32>
    %2 = tpu.iota {dimensions = array<i32: 2>} : vector<1x8x2xi32>
    %c2_i32_0 = arith.constant 2 : i32
    %3 = vector.broadcast %c2_i32_0 : i32 to vector<1x8x2xi32>
    %4 = arith.muli %1, %3 : vector<1x8x2xi32>
    %5 = arith.addi %4, %2 : vector<1x8x2xi32>
    %c0_i32 = arith.constant 0 : i32
    %6 = arith.addi %0, %c0_i32 : i32
    %7 = arith.index_cast %6 : i32 to index
    %8 = memref.load %arg1[%7] : memref<2xi32, #tpu.memory_space<smem>>
    %c1_i32 = arith.constant 1 : i32
    %9 = arith.addi %0, %c1_i32 : i32
    %10 = arith.index_cast %9 : i32 to index
    %11 = memref.load %arg1[%10] : memref<2xi32, #tpu.memory_space<smem>>
    %c0 = arith.constant 0 : index
    %c0_1 = arith.constant 0 : index
    %c0_2 = arith.constant 0 : index
    %12 = vector.load %arg3[%c0, %c0_1, %c0_2] : memref<2x8x2xf32, #tpu.memory_space<vmem>>, vector<1x8x2xf32>
    %cst = arith.constant 5.000000e-01 : f32
    %13 = vector.broadcast %cst : f32 to vector<1x8x2xf32>
    %14 = arith.cmpf ogt, %12, %13 : vector<1x8x2xf32>
    %cst_3 = arith.constant 1.000000e+30 : f32
    %cst_4 = arith.constant -1.000000e+02 : f32
    %15 = vector.broadcast %cst_3 : f32 to vector<1x8x2xf32>
    %16 = vector.broadcast %cst_4 : f32 to vector<1x8x2xf32>
    %17 = arith.select %14, %15, %16 : vector<1x8x2xi1>, vector<1x8x2xf32>
    %c1 = arith.constant 1 : index
    %c0_5 = arith.constant 0 : index
    %c0_6 = arith.constant 0 : index
    %18 = vector.load %arg3[%c1, %c0_5, %c0_6] : memref<2x8x2xf32, #tpu.memory_space<vmem>>, vector<1x8x2xf32>
    %cst_7 = arith.constant 5.000000e-01 : f32
    %19 = vector.broadcast %cst_7 : f32 to vector<1x8x2xf32>
    %20 = arith.cmpf ogt, %18, %19 : vector<1x8x2xf32>
    %cst_8 = arith.constant 1.000000e+30 : f32
    %cst_9 = arith.constant -1.000000e+02 : f32
    %21 = vector.broadcast %cst_8 : f32 to vector<1x8x2xf32>
    %22 = vector.broadcast %cst_9 : f32 to vector<1x8x2xf32>
    %23 = arith.select %20, %21, %22 : vector<1x8x2xi1>, vector<1x8x2xf32>
    %24 = tpu.iota {dimensions = array<i32: 1>} : vector<1x8xi32>
    %c0_i32_10 = arith.constant 0 : i32
    %25 = vector.broadcast %c0_i32_10 : i32 to vector<1x8xi32>
    %c0_i32_11 = arith.constant 0 : i32
    %26 = vector.broadcast %c0_i32_11 : i32 to vector<1x8xi32>
    %c0_i32_12 = arith.constant 0 : i32
    %c8_i32 = arith.constant 8 : i32
    %27 = arith.addi %c0_i32_12, %c8_i32 : i32
    %c1_i32_13 = arith.constant 1 : i32
    %28:6 = scf.for %arg5 = %c0_i32_12 to %27 step %c1_i32_13 iter_args(%arg6 = %8, %arg7 = %11, %arg8 = %17, %arg9 = %23, %arg10 = %25, %arg11 = %26) -> (i32, i32, vector<1x8x2xf32>, vector<1x8x2xf32>, vector<1x8xi32>, vector<1x8xi32>)  : i32 {
      %31 = vector.broadcast %arg5 : i32 to vector<1x8xi32>
      %32 = arith.cmpi eq, %24, %31 : vector<1x8xi32>
      %33 = vector.broadcast %arg6 : i32 to vector<1x8xi32>
      %34 = arith.select %32, %33, %arg10 : vector<1x8xi1>, vector<1x8xi32>
      %c0_19 = arith.constant 0 : index
      %35 = arith.index_cast %arg6 : i32 to index
      %c0_20 = arith.constant 0 : index
      %c0_21 = arith.constant 0 : index
      %36 = vector.load %arg2[%c0_19, %35, %c0_20, %c0_21] : memref<2x16x8x2xf32, #tpu.memory_space<vmem>>, vector<1x1x8x2xf32>
      %37 = vector.shape_cast %36 : vector<1x1x8x2xf32> to vector<1x8x2xf32>
      %38 = arith.minimumf %arg8, %37 : vector<1x8x2xf32>
      %39 = vector.shape_cast %38 : vector<1x8x2xf32> to vector<1x1x8x2xf32>
      %cst_22 = arith.constant dense<0xFF800000> : vector<1xf32>
      %40 = vector.multi_reduction <maximumf>, %39, %cst_22 [1, 2, 3] : vector<1x1x8x2xf32> to vector<1xf32>
      %41 = vector.shape_cast %40 : vector<1xf32> to vector<1x1x1x1xf32>
      %42 = vector.extract %41[0, 0, 0, 0] : f32 from vector<1x1x1x1xf32>
      %43 = vector.broadcast %42 : f32 to vector<1x8x2xf32>
      %44 = arith.cmpf oeq, %38, %43 : vector<1x8x2xf32>
      %c16_i32 = arith.constant 16 : i32
      %45 = vector.broadcast %c16_i32 : i32 to vector<1x8x2xi32>
      %46 = arith.select %44, %5, %45 : vector<1x8x2xi1>, vector<1x8x2xi32>
      %47 = vector.shape_cast %46 : vector<1x8x2xi32> to vector<1x1x8x2xi32>
      %cst_23 = arith.constant dense<2147483647> : vector<1xi32>
      %48 = vector.multi_reduction <minsi>, %47, %cst_23 [1, 2, 3] : vector<1x1x8x2xi32> to vector<1xi32>
      %49 = vector.shape_cast %48 : vector<1xi32> to vector<1x1x1x1xi32>
      %50 = vector.extract %49[0, 0, 0, 0] : i32 from vector<1x1x1x1xi32>
      %51 = vector.broadcast %arg5 : i32 to vector<1x8xi32>
      %52 = arith.cmpi eq, %24, %51 : vector<1x8xi32>
      %53 = vector.broadcast %arg7 : i32 to vector<1x8xi32>
      %54 = arith.select %52, %53, %arg11 : vector<1x8xi1>, vector<1x8xi32>
      %c1_24 = arith.constant 1 : index
      %55 = arith.index_cast %arg7 : i32 to index
      %c0_25 = arith.constant 0 : index
      %c0_26 = arith.constant 0 : index
      %56 = vector.load %arg2[%c1_24, %55, %c0_25, %c0_26] : memref<2x16x8x2xf32, #tpu.memory_space<vmem>>, vector<1x1x8x2xf32>
      %57 = vector.shape_cast %56 : vector<1x1x8x2xf32> to vector<1x8x2xf32>
      %58 = arith.minimumf %arg9, %57 : vector<1x8x2xf32>
      %59 = vector.shape_cast %58 : vector<1x8x2xf32> to vector<1x1x8x2xf32>
      %cst_27 = arith.constant dense<0xFF800000> : vector<1xf32>
      %60 = vector.multi_reduction <maximumf>, %59, %cst_27 [1, 2, 3] : vector<1x1x8x2xf32> to vector<1xf32>
      %61 = vector.shape_cast %60 : vector<1xf32> to vector<1x1x1x1xf32>
      %62 = vector.extract %61[0, 0, 0, 0] : f32 from vector<1x1x1x1xf32>
      %63 = vector.broadcast %62 : f32 to vector<1x8x2xf32>
      %64 = arith.cmpf oeq, %58, %63 : vector<1x8x2xf32>
      %c16_i32_28 = arith.constant 16 : i32
      %65 = vector.broadcast %c16_i32_28 : i32 to vector<1x8x2xi32>
      %66 = arith.select %64, %5, %65 : vector<1x8x2xi1>, vector<1x8x2xi32>
      %67 = vector.shape_cast %66 : vector<1x8x2xi32> to vector<1x1x8x2xi32>
      %cst_29 = arith.constant dense<2147483647> : vector<1xi32>
      %68 = vector.multi_reduction <minsi>, %67, %cst_29 [1, 2, 3] : vector<1x1x8x2xi32> to vector<1xi32>
      %69 = vector.shape_cast %68 : vector<1xi32> to vector<1x1x1x1xi32>
      %70 = vector.extract %69[0, 0, 0, 0] : i32 from vector<1x1x1x1xi32>
      scf.yield %50, %70, %38, %58, %34, %54 : i32, i32, vector<1x8x2xf32>, vector<1x8x2xf32>, vector<1x8xi32>, vector<1x8xi32>
    }
    %c8_i32_14 = arith.constant 8 : i32
    %c0_15 = arith.constant 0 : index
    %c0_16 = arith.constant 0 : index
    %29 = vector.load %arg4[%c0_15, %c0_16] : memref<2x8xi32, #tpu.memory_space<vmem>>, vector<1x8xi32>
    tpu.vector_store %arg4[%c0_15, %c0_16], %28#4 {strides = array<i32>} : memref<2x8xi32, #tpu.memory_space<vmem>>, vector<1x8xi32>,
    %c1_17 = arith.constant 1 : index
    %c0_18 = arith.constant 0 : index
    %30 = vector.load %arg4[%c1_17, %c0_18] : memref<2x8xi32, #tpu.memory_space<vmem>>, vector<1x8xi32>
    tpu.vector_store %arg4[%c1_17, %c0_18], %28#5 {strides = array<i32>} : memref<2x8xi32, #tpu.memory_space<vmem>>, vector<1x8xi32>,
    return
  }
  func.func @transform_0(%arg0: i32, %arg1: memref<2xi32, #tpu.memory_space<smem>>) -> (i32, i32, i32, i32) {
    %c0_i32 = arith.constant 0 : i32
    %c0_i32_0 = arith.constant 0 : i32
    %c0_i32_1 = arith.constant 0 : i32
    %c0_i32_2 = arith.constant 0 : i32
    return %arg0, %c0_i32, %c0_i32_0, %c0_i32_1 : i32, i32, i32, i32
  }
  func.func @transform_1(%arg0: i32, %arg1: memref<2xi32, #tpu.memory_space<smem>>) -> (i32, i32, i32) {
    %c0_i32 = arith.constant 0 : i32
    %c0_i32_0 = arith.constant 0 : i32
    %c0_i32_1 = arith.constant 0 : i32
    return %arg0, %c0_i32, %c0_i32_0 : i32, i32, i32
  }
  func.func @transform_2(%arg0: i32, %arg1: memref<2xi32, #tpu.memory_space<smem>>) -> (i32, i32) {
    %c0_i32 = arith.constant 0 : i32
    %c0_i32_0 = arith.constant 0 : i32
    return %arg0, %c0_i32 : i32, i32
  }
}

</mosaic_0001>

<bundles_post_ra>
// kernel: tpu_custom_call.1
= control target key start
LH: loop header
LB: loop body
LE: loop exit
PB: predicated region body
PF: predicated region fallthrough
CT: control target
= control target key end

     0   :  { %s474_s0 = inlined_call_operand.vmem [shape: s32[2], index: 0, kind: input, shape index: {}]   ;;  %s475_s1 = inlined_call_operand.vmem [shape: f32[2,16,8,2], index: 1, kind: input, shape index: {}]   ;;  %s476_s2 = inlined_call_operand.vmem [shape: f32[2,8,2], index: 2, kind: input, shape index: {}]   ;;  %s477_s3 = inlined_call_operand.hbm [shape: s32[2,8], index: 3, kind: output, shape index: {}]  }
   0x1   :  { %s8_s14 = sshll.u32 %s474_s0, 4  ;;  %s9_s14 = int_to_ptr.vmem [resolvable:$true] %s8_s14 }
   0x2   :  { %s257_s15 = scalar_lea.vmem %s9_s14, 16  ;;  %p262_p1 = scmp.lt.s32.totalorder %s9_s14, %s9_s14 }
   0x3   :  { %p258_p0 = scmp.ne.s32.totalorder %s9_s14, %s257_s15  ;;  %p263_p2 = scmp.lt.s32.totalorder %s257_s15, %s257_s15 }
   0x5   :  { %p264_p3 = por %p263_p2, %p262_p1 }
   0x7   :  { %p265_p4 = pnand %p264_p3, %p258_p0 }
   0x9   :  { %268 = shalt.err (!%p265_p4)  }
   0xa   :  { %s349_s16 = smov [#allocation3]  }
   0xb   :  { %11 = dma.vmem_to_smem %s9_s14, 16, %s349_s16, [#allocation2] }
   0xc   :  { %317 = dma.done.wait [#allocation2], 16 }
   0xd   :  { %318 = vsyncadd [#allocation2], 4294967280 }
   0xe   :  { %13 = sfence }
   0xf   :  { %14 = vsyncpa [#allocation5], 0  ;;  %v20_v0 = vlaneseq  ;;  %s26_s17 = sld [smem:[#allocation3]]   ;;  %v29_v1 = vld [vmem:[%s476_s2] sm:$0xff]  ;;  %v186_v2 = vld [vmem:[%s476_s2 + $0x8] sm:$0xff]  ;;  %v350_v5 = vmov -100.0  }
  0x10   :  { %s185_s0 = sld [smem:[#allocation3 + $0x1]]   ;;  %vm30_vm0 = vcmp.gt.f32.partialorder %v29_v1, 0.5  ;;  %vm34_vm1 = vcmp.gt.f32.partialorder %v186_v2, 0.5  ;;  %v386_v10 = vmov 0   ;;  %v388_v11 = vmov 0   ;;  %s398_s2 = smov 0  }
  0x11   :  { %v21_v3 = vshrl.u32 %v20_v0, 7  ;;  %v381_v4 = vand.u32 127, %v20_v0  ;;  %v31_v6 = vsel %vm30_vm0, 1e+30, %v350_v5   ;;  %v35_v7 = vsel %vm34_vm1, 1e+30, %v350_v5  }
  0x13   :  { %v24_v8 = vmul.u32 2, %v21_v3 }
  0x15   :  { %v384_v9 = vadd.s32 %v24_v8, %v381_v4 }
  0x16 LB: > { %v48_v12 = vstv %s347_s2  ;;  %v50_v13 = vstv %s343_s17  ;;  %s187_s22 = sshll.u32 %s343_s17, 3  ;;  %vm56_vm3 = vcmask 15360   ;;  %v95_v30 = vstv %s339_s0  ;;  %s188_s27 = sshll.u32 %s339_s0, 3  ;;  %s347_s2 = sphi %s398_s2, %s41_s2   ;;  %s343_s17 = sphi %s26_s17, %s444_s17   ;;  %s339_s0 = sphi %s185_s0, %s197_s0   ;;  %v335_v6 = vphi %v31_v6, %v424_v6   ;;  %v331_v7 = vphi %v35_v7, %v440_v7   ;;  %v327_v11 = vphi %v388_v11, %v483_v11   ;;  %v323_v10 = vphi %v386_v10, %v482_v10  }
  0x17   : > { %vm413_vm2 = vcmp.eq.s32.totalorder %v381_v4, %v48_v12  ;;  %s53_s25 = scalar_lea.vmem %s475_s1, %s187_s22  ;;  %s160_s30 = scalar_lea.vmem %s475_s1, %s188_s27 }
  0x18   : > { %v54_v15 = vld [vmem:[%s53_s25] sm:$0xff]  ;;  %v422_v11 = vsel %vm413_vm2, %v50_v13, %v327_v11   ;;  %v434_v10 = vsel %vm413_vm2, %v95_v30, %v323_v10   ;;  %s41_s2 = sadd.s32 1, %s347_s2  }
  0x19   : > { %v480_v16 = vmov %v422_v11  ;;  %v424_v6 = vmin.f32 %v335_v6, %v54_v15   ;;  %v481_v31 = vmov %v434_v10  ;;  %v189_v33 = vld [vmem:[%s160_s30 + $0x80] sm:$0xff]  ;;  %p38_p5 = scmp.ge.s32.totalorder %s41_s2, 8  }
  0x1a   : > { %v440_v7 = vmin.f32 %v331_v7, %v189_v33   ;;  %vm140_vm14 = vcmask (%p38_p5), 57344   ;;  %s351_s5 = smov (%p38_p5), [#allocation4]  }
  0x1b   : > { %v57_v17 = vsel %vm56_vm3, %v424_v6, -inf  ;;  %141 = vst.msk [vmem:[#allocation4] sm:$0x1] (%p38_p5), %vm140_vm14, %v480_v16  ;;  %142 = vst.msk [vmem:[#allocation4 + $0x1] sm:$0x1] (%p38_p5), %vm140_vm14, %v481_v31  ;;  %s149_s6 = sshll.u32 (%p38_p5), %s351_s5, 4  ;;  %s150_s6 = int_to_ptr.vmem [resolvable:$true] %s149_s6 }
  0x1c   : > { %58 = vmax.xlane.f32.xlu0 %v57_v17  ;;  %v102_v37 = vsel %vm56_vm3, %v440_v7, -inf  ;;  %s269_s7 = scalar_lea.vmem (%p38_p5), %s150_s6, 32  ;;  %p274_p7 = scmp.lt.s32.totalorder (%p38_p5), %s150_s6, %s150_s6 }
  0x1d   :  { %p270_p6 = scmp.ne.s32.totalorder (%p38_p5), %s150_s6, %s269_s7  ;;  %p275_p8 = scmp.lt.s32.totalorder (%p38_p5), %s269_s7, %s269_s7 }
  0x1f   :  { %p276_p9 = por (%p38_p5), %p275_p8, %p274_p7 }
  0x21   :  { %p277_p10 = pnand (%p38_p5), %p276_p9, %p270_p6 }
  0xa5   : > { %v59_v18 = vpop.xlane.xlu0 %58 }
  0xa6   : > { %v60_v19 = vrot.slane %v59_v18, 4 }
  0xa8   : > { %v61_v20 = vmax.f32 %v59_v18, %v60_v19 }
  0xaa   : > { %v62_v21 = vrot.slane %v61_v20, 2 }
  0xac   : > { %v63_v22 = vmax.f32 %v61_v20, %v62_v21 }
  0xae   : > { %v64_v23 = vrot.slane %v63_v22, 1 }
  0xb0   : > { %v65_v24 = vmax.f32 %v63_v22, %v64_v23 }
  0xb2   : > { %190 = vpush %v65_v24 }
  0xe3   : > { %s191_s26 = spop %190 }
  0xe4   : > { %v67_v25 = vstv %s191_s26 }
  0xe5   : > { %vm68_vm4 = vcmp.eq.f32.partialorder %v424_v6, %v67_v25 }
  0xe6   : > { %v69_v26 = vsel %vm68_vm4, %v384_v9, 16 }
  0xe7   : > { %v70_v27 = vsel %vm56_vm3, %v69_v26, 2147483647 }
  0xe8   : > { %v72_v28 = vshra.s32 %v70_v27, 16  ;;  %v71_v32 = vand.u32 65535, %v70_v27 }
  0xea   : > { %v74_v29 = vcvt.s32.f32 %v72_v28  ;;  %v73_v35 = vcvt.s32.f32 %v71_v32 }
  0xec   : > { %75 = vmin.xlane.f32.xlu0 %v74_v29 }
 0x175   : > { %v76_v34 = vpop.xlane.xlu0 %75 }
 0x176   : > { %vm77_vm5 = vcmp.eq.f32.partialorder %v74_v29, %v76_v34  ;;  %v82_v38 = vcvt.f32.s32 %v76_v34 }
 0x177   : > { %v78_v36 = vsel %vm77_vm5, %v73_v35, inf }
 0x178   : > { %79 = vmin.xlane.f32.xlu1 %v78_v36  ;;  %v83_v40 = vshll.u32 %v82_v38, 16 }
 0x17c   : > { %103 = vmax.xlane.f32.xlu1 %v102_v37 }
 0x201   : > { %v80_v39 = vpop.xlane.xlu1 %79 }
 0x202   : > { %v81_v41 = vcvt.f32.s32 %v80_v39 }
 0x204   : > { %v84_v42 = vadd.s32 %v83_v40, %v81_v41 }
 0x205   : > { %v104_v43 = vpop.xlane.xlu1 %103 }
 0x206   : > { %v85_v44 = vrot.slane %v84_v42, 4  ;;  %v105_v45 = vrot.slane %v104_v43, 4 }
 0x208   : > { %vm86_vm6 = vcmp.lt.s32.totalorder %v84_v42, %v85_v44  ;;  %v106_v46 = vmax.f32 %v104_v43, %v105_v45 }
 0x209   : > { %v87_v47 = vsel %vm86_vm6, %v84_v42, %v85_v44 }
 0x20a   : > { %v107_v48 = vrot.slane %v106_v46, 2  ;;  %v88_v49 = vrot.slane %v87_v47, 2 }
 0x20c   : > { %vm89_vm7 = vcmp.lt.s32.totalorder %v87_v47, %v88_v49  ;;  %v108_v50 = vmax.f32 %v106_v46, %v107_v48 }
 0x20d   : > { %v90_v51 = vsel %vm89_vm7, %v87_v47, %v88_v49 }
 0x20e   : > { %v91_v52 = vrot.slane %v90_v51, 1  ;;  %v109_v53 = vrot.slane %v108_v50, 1 }
 0x210   : > { %vm92_vm8 = vcmp.lt.s32.totalorder %v90_v51, %v91_v52  ;;  %v110_v54 = vmax.f32 %v108_v50, %v109_v53 }
 0x211   : > { %v93_v55 = vsel %vm92_vm8, %v90_v51, %v91_v52 }
 0x212   : > { %192 = vpush %v93_v55 }
 0x213   : > { %194 = vpush %v110_v54 }
 0x243   : > { %s444_s17 = spop %192  }
 0x244   : > { %s195_s4 = spop %194 }
 0x245   : > { %v112_v56 = vstv %s195_s4 }
 0x246   : > { %vm113_vm9 = vcmp.eq.f32.partialorder %v440_v7, %v112_v56 }
 0x247   : > { %v114_v57 = vsel %vm113_vm9, %v384_v9, 16 }
 0x248   : > { %v115_v58 = vsel %vm56_vm3, %v114_v57, 2147483647 }
 0x249   : > { %v117_v59 = vshra.s32 %v115_v58, 16  ;;  %v116_v61 = vand.u32 65535, %v115_v58 }
 0x24b   : > { %v119_v60 = vcvt.s32.f32 %v117_v59  ;;  %v118_v63 = vcvt.s32.f32 %v116_v61 }
 0x24d   : > { %120 = vmin.xlane.f32.xlu0 %v119_v60 }
 0x2d6   : > { %v121_v62 = vpop.xlane.xlu0 %120 }
 0x2d7   : > { %vm122_vm10 = vcmp.eq.f32.partialorder %v119_v60, %v121_v62  ;;  %v127_v1 = vcvt.f32.s32 %v121_v62 }
 0x2d8   : > { %v123_v0 = vsel %vm122_vm10, %v118_v63, inf }
 0x2d9   : > { %124 = vmin.xlane.f32.xlu1 %v123_v0  ;;  %v128_v3 = vshll.u32 %v127_v1, 16 }
 0x362   : > { %v125_v2 = vpop.xlane.xlu1 %124 }
 0x363   : > { %v126_v5 = vcvt.f32.s32 %v125_v2 }
 0x365   : > { %v129_v8 = vadd.s32 %v128_v3, %v126_v5 }
 0x367   : > { %v130_v10 = vrot.slane %v129_v8, 4 }
 0x369   : > { %vm131_vm11 = vcmp.lt.s32.totalorder %v129_v8, %v130_v10 }
 0x36a   : > { %v132_v11 = vsel %vm131_vm11, %v129_v8, %v130_v10  ;;  %v482_v10 = vmov %v481_v31 }
 0x36b   : > { %v133_v12 = vrot.slane %v132_v11, 2 }
 0x36d   : > { %vm134_vm12 = vcmp.lt.s32.totalorder %v132_v11, %v133_v12 }
 0x36e   : > { %v135_v13 = vsel %vm134_vm12, %v132_v11, %v133_v12  ;;  %v483_v11 = vmov %v480_v16 }
 0x36f   : > { %v136_v14 = vrot.slane %v135_v13, 1 }
 0x371   : > { %vm137_vm13 = vcmp.lt.s32.totalorder %v135_v13, %v136_v14 }
 0x372   : > { %v138_v15 = vsel %vm137_vm13, %v135_v13, %v136_v14 }
 0x373   : > { %196 = vpush %v138_v15 }
 0x3a0   :  { %40 = sbr.rel (!%p38_p5) target bundleno = 22 (0x16), region = 38 }
 0x3a4   : > { %s197_s0 = spop %196  }
 0x3a5   :  { %280 = shalt.err (!%p277_p10)
}
 0x3a6   :  { %152 = dma.vmem_to_hbm [thread:$0]  %s150_s6, 32, %s477_s3, [#allocation5]  }
 0x3a7   :  { %319 = dma.done.wait [#allocation5], 32  }
 0x3a8   :  { %320 = vsyncadd [#allocation5], 4294967264 }
 0x3a9   :  { %156 = vsyncpa [#allocation5], 1 }

</bundles_post_ra>
